<compile_context>
chip_gen: v7x
topology: tpu7x:2x2x1
jax: 0.10.0
libtpu: 0.0.40
codegen_flags: <defaults>
</compile_context>

<pallas_src>
import functools

import jax
import jax.numpy as jnp
import numpy as np
from jax.experimental import pallas as pl
from jax.experimental.pallas import tpu as pltpu


def _gbn_kernel(x_ref, gamma_ref, bias_ref, y_ref, m_ref, s_ref, *, eps, inv_nm1):
    # x_ref block: (1, GBS, C_TILE) in the input dtype; gamma/bias block: (1, C_TILE) f32.
    x = x_ref[0].astype(jnp.float32)                     # (GBS, C_TILE), f32 compute

    mean = jnp.mean(x, axis=0, keepdims=True)            # (1, C_TILE)   XLU reduce
    diff = x - mean                                       # reused for var AND normalize
    # torch Tensor.var(dim=1) defaults to unbiased (correction=1)
    var = jnp.sum(diff * diff, axis=0, keepdims=True) * jnp.float32(inv_nm1)
    std = jnp.sqrt(var + jnp.float32(eps))                # (1, C_TILE)

    # Exact f32 reciprocal on the row only (negligible cost, full accuracy).
    inv_std = jnp.float32(1.0) / std

    scale = gamma_ref[...] * inv_std                      # (1, C_TILE)  == gamma / std

    # y = ((x - mean) / std) * gamma + bias  -> single fused mul+add on the full tile.
    y_ref[0] = (diff * scale + bias_ref[...]).astype(y_ref.dtype)
    m_ref[0] = mean.astype(m_ref.dtype)
    s_ref[0] = std.astype(s_ref.dtype)


def _choose_c_tile(C, gbs, itemsize, *, max_tile_bytes=2 << 20, max_lanes=2048):
    """Largest multiple of 128 dividing C whose (GBS, C_TILE) x-block stays in budget."""
    if C % 128 != 0:
        # TODO(synk): pad C to a multiple of 128 in the wrapper for lane-dense stores
        # when features*prod(remaining_dim) is not 128-aligned (masked vst otherwise).
        return C
    byte_cap = max(128, (max_tile_bytes // max(1, gbs * itemsize)) // 128 * 128)
    cap = min(C, max_lanes, byte_cap)
    best = 128
    for t in range(128, cap + 1, 128):
        if C % t == 0:
            best = t
    return best


def ghost_batch_norm_forward(x, gamma, bias, *, n_ghost_batches, eta=0.9, eps=1e-5,
                             running_m=None, running_s=None, c_tile=None):
    """Training-mode forward of Ghost_Batch_Norm.

    x:      (batch, features, *remaining_dim), f32 or bf16
    gamma:  (features,)
    bias:   (features,)
    Returns (y, new_m, new_s); y has x's shape/dtype, new_m/new_s are the updated
    running statistics (f32) with shape (features, *remaining_dim).
    """
    batch_size = x.shape[0]
    features = x.shape[1]
    remaining = x.shape[2:]
    assert batch_size % n_ghost_batches == 0
    gbs = batch_size // n_ghost_batches
    assert gbs >= 2, "unbiased variance (correction=1) requires ghost_batch_size >= 2"
    spatial = int(np.prod(remaining)) if remaining else 1
    C = features * spatial

    itemsize = np.dtype(x.dtype).itemsize
    if c_tile is None:
        c_tile = _choose_c_tile(C, gbs, itemsize)
    assert C % c_tile == 0
    num_c_tiles = C // c_tile

    # Free reshape (no copy, no dtype change): lane axis carries feature*spatial,
    # sublane axis carries the ghost-batch samples the reduction runs over.
    x_r = x.reshape(n_ghost_batches, gbs, C)

    # Parameter broadcast matches gamma.view(F, 1, ..., 1) * x + bias (tiny, f32).
    gamma_full = jnp.broadcast_to(
        gamma.astype(jnp.float32).reshape(features, 1), (features, spatial)
    ).reshape(1, C)
    bias_full = jnp.broadcast_to(
        bias.astype(jnp.float32).reshape(features, 1), (features, spatial)
    ).reshape(1, C)

    # Explicit VMEM budget: double-buffered x-in + y-out tiles plus small f32 rows;
    # clamp to [32, 48] MiB so the request also fits v7x's 64 MiB physical VMEM.
    x_tile_bytes = gbs * c_tile * itemsize
    per_step_bytes = 2 * (2 * x_tile_bytes) + 2 * 4 * (c_tile * 4)
    vmem_limit_bytes = int(min(max(per_step_bytes + (8 << 20), 32 << 20), 48 << 20))

    kernel = functools.partial(_gbn_kernel, eps=eps, inv_nm1=1.0 / (gbs - 1))

    y_r, gbm, gbstd = pl.pallas_call(
        kernel,
        out_shape=(
            jax.ShapeDtypeStruct((n_ghost_batches, gbs, C), x.dtype),
            jax.ShapeDtypeStruct((n_ghost_batches, 1, C), jnp.float32),
            jax.ShapeDtypeStruct((n_ghost_batches, 1, C), jnp.float32),
        ),
        grid_spec=pltpu.PrefetchScalarGridSpec(
            num_scalar_prefetch=0,
            grid=(n_ghost_batches, num_c_tiles),
            in_specs=[
                pl.BlockSpec((1, gbs, c_tile), lambda g, c: (g, 0, c)),
                pl.BlockSpec((1, c_tile), lambda g, c: (0, c)),
                pl.BlockSpec((1, c_tile), lambda g, c: (0, c)),
            ],
            out_specs=[
                pl.BlockSpec((1, gbs, c_tile), lambda g, c: (g, 0, c)),
                pl.BlockSpec((1, 1, c_tile), lambda g, c: (g, 0, c)),
                pl.BlockSpec((1, 1, c_tile), lambda g, c: (g, 0, c)),
            ],
        ),
        compiler_params=pltpu.CompilerParams(
            dimension_semantics=("parallel", "parallel"),
            vmem_limit_bytes=vmem_limit_bytes,
        ),
    )(x_r, gamma_full, bias_full)

    y = y_r.reshape((batch_size, features) + remaining)

    # Running-statistics EMA (buffer side effect in the torch module) — plain JAX glue.
    bm = jnp.mean(gbm, axis=0).reshape((features,) + remaining)
    bs = jnp.mean(gbstd, axis=0).reshape((features,) + remaining)
    if running_m is None:
        new_m, new_s = bm, bs
    else:
        new_m = eta * running_m + (1.0 - eta) * bm
        new_s = eta * running_s + (1.0 - eta) * bs
    return y, new_m, new_s


def _reference_forward(x, gamma, bias, *, n_ghost_batches, eps=1e-5):
    """Pure-JAX replica of the torch forward (training path), for verification."""
    xf = x.astype(jnp.float32)
    batch_size, features = xf.shape[0], xf.shape[1]
    remaining = xf.shape[2:]
    gbs = batch_size // n_ghost_batches
    xg = xf.reshape((n_ghost_batches, gbs, features) + remaining)
    gbm = jnp.mean(xg, axis=1, keepdims=True)
    gbv = jnp.sum((xg - gbm) ** 2, axis=1, keepdims=True) / (gbs - 1)   # unbiased
    gbstd = jnp.sqrt(gbv + eps)
    xn = ((xg - gbm) / gbstd).reshape((batch_size, features) + remaining)
    dummy = (features,) + (1,) * len(remaining)
    y = xn * gamma.astype(jnp.float32).reshape(dummy) + bias.astype(jnp.float32).reshape(dummy)
    bm = jnp.mean(gbm, axis=0)[0].reshape((features,) + remaining)
    bs = jnp.mean(gbstd, axis=0)[0].reshape((features,) + remaining)
    return y, bm, bs


if __name__ == "__main__":
    key = jax.random.PRNGKey(0)

    def run_case(idx, batch, features, spatial, n_gb, dtype, c_tile=None, y_tol=1e-5):
        kx, kg, kb = jax.random.split(jax.random.fold_in(key, idx), 3)
        x = jax.random.normal(kx, (batch, features) + spatial, dtype=jnp.float32).astype(dtype)
        gamma = jnp.ones((features,), jnp.float32) + 0.1 * jax.random.normal(kg, (features,), jnp.float32)
        bias = 0.1 * jax.random.normal(kb, (features,), jnp.float32)

        y, m, s = ghost_batch_norm_forward(
            x, gamma, bias, n_ghost_batches=n_gb, eta=0.9, eps=1e-5,
            running_m=None, running_s=None, c_tile=c_tile,
        )
        jax.block_until_ready((y, m, s))

        y_ref, bm_ref, bs_ref = _reference_forward(x, gamma, bias, n_ghost_batches=n_gb, eps=1e-5)
        np.testing.assert_allclose(np.asarray(y.astype(jnp.float32)), np.asarray(y_ref),
                                   rtol=y_tol, atol=y_tol)
        np.testing.assert_allclose(np.asarray(m), np.asarray(bm_ref), rtol=1e-5, atol=1e-5)
        np.testing.assert_allclose(np.asarray(s), np.asarray(bs_ref), rtol=1e-5, atol=1e-5)

    # Config A: C = 8*16 = 128 lanes (single C tile), grid (4, 1), f32.
    run_case(0, 32, 8, (16,), 4, jnp.float32)
    # Config B: C = 16*8*16 = 2048 lanes, forced c_tile=512 -> grid (4, 4), both axes parallel.
    run_case(1, 32, 16, (8, 16), 4, jnp.float32, c_tile=512)
    # Config C: bf16 input/output, f32 reduction inside the kernel (no wrapper upcast).
    run_case(2, 32, 8, (16,), 4, jnp.bfloat16, y_tol=5e-2)

    print("KERNEL_OK")
</pallas_src>

<mosaic_0001>
module attributes {stable_mosaic.version = 11 : i64} {
  func.func @_gbn_kernel(%arg0: i32, %arg1: i32, %arg2: memref<1x8x128xf32, #tpu.memory_space<vmem>>, %arg3: memref<1x128xf32, #tpu.memory_space<vmem>>, %arg4: memref<1x128xf32, #tpu.memory_space<vmem>>, %arg5: memref<1x8x128xf32, #tpu.memory_space<vmem>>, %arg6: memref<1x1x128xf32, #tpu.memory_space<vmem>>, %arg7: memref<1x1x128xf32, #tpu.memory_space<vmem>>) attributes {dimension_semantics = [#tpu.dimension_semantics<parallel>, #tpu.dimension_semantics<parallel>], iteration_bounds = array<i64: 4, 1>, scalar_prefetch = 0 : i64, scratch_operands = 0 : i64, tpu.core_type = #tpu.core_type<tc>, window_params = [{transform_indices = @transform_0, window_bounds = array<i64: 1, 8, 128>}, {transform_indices = @transform_1, window_bounds = array<i64: 1, 128>}, {transform_indices = @transform_2, window_bounds = array<i64: 1, 128>}, {transform_indices = @transform_3, window_bounds = array<i64: 1, 8, 128>}, {transform_indices = @transform_4, window_bounds = array<i64: 1, 1, 128>}, {transform_indices = @transform_5, window_bounds = array<i64: 1, 1, 128>}]} {
    %c0 = arith.constant 0 : index
    %c0_0 = arith.constant 0 : index
    %c0_1 = arith.constant 0 : index
    %0 = vector.load %arg2[%c0, %c0_0, %c0_1] : memref<1x8x128xf32, #tpu.memory_space<vmem>>, vector<1x8x128xf32>
    %1 = vector.shape_cast %0 : vector<1x8x128xf32> to vector<8x128xf32>
    %cst = arith.constant dense<0.000000e+00> : vector<128xf32>
    %2 = vector.multi_reduction <add>, %1, %cst [0] : vector<8x128xf32> to vector<128xf32>
    %3 = vector.shape_cast %2 : vector<128xf32> to vector<1x128xf32>
    %cst_2 = arith.constant 8.000000e+00 : f32
    %4 = vector.broadcast %cst_2 : f32 to vector<1x128xf32>
    %5 = arith.divf %3, %4 : vector<1x128xf32>
    %6 = vector.broadcast %5 : vector<1x128xf32> to vector<8x128xf32>
    %7 = arith.subf %1, %6 : vector<8x128xf32>
    %8 = arith.mulf %7, %7 : vector<8x128xf32>
    %cst_3 = arith.constant dense<0.000000e+00> : vector<128xf32>
    %9 = vector.multi_reduction <add>, %8, %cst_3 [0] : vector<8x128xf32> to vector<128xf32>
    %10 = vector.shape_cast %9 : vector<128xf32> to vector<1x128xf32>
    %cst_4 = arith.constant 0.142857149 : f32
    %11 = vector.broadcast %cst_4 : f32 to vector<1x128xf32>
    %12 = arith.mulf %10, %11 : vector<1x128xf32>
    %cst_5 = arith.constant 9.99999974E-6 : f32
    %13 = vector.broadcast %cst_5 : f32 to vector<1x128xf32>
    %14 = arith.addf %12, %13 : vector<1x128xf32>
    %15 = math.sqrt %14 : vector<1x128xf32>
    %cst_6 = arith.constant 1.000000e+00 : f32
    %16 = vector.broadcast %cst_6 : f32 to vector<1x128xf32>
    %17 = arith.divf %16, %15 : vector<1x128xf32>
    %c0_7 = arith.constant 0 : index
    %c0_8 = arith.constant 0 : index
    %18 = vector.load %arg3[%c0_7, %c0_8] : memref<1x128xf32, #tpu.memory_space<vmem>>, vector<1x128xf32>
    %19 = arith.mulf %18, %17 : vector<1x128xf32>
    %20 = vector.broadcast %19 : vector<1x128xf32> to vector<8x128xf32>
    %21 = arith.mulf %7, %20 : vector<8x128xf32>
    %c0_9 = arith.constant 0 : index
    %c0_10 = arith.constant 0 : index
    %22 = vector.load %arg4[%c0_9, %c0_10] : memref<1x128xf32, #tpu.memory_space<vmem>>, vector<1x128xf32>
    %23 = vector.broadcast %22 : vector<1x128xf32> to vector<8x128xf32>
    %24 = arith.addf %21, %23 : vector<8x128xf32>
    %c0_11 = arith.constant 0 : index
    %c0_12 = arith.constant 0 : index
    %c0_13 = arith.constant 0 : index
    %25 = vector.load %arg5[%c0_11, %c0_12, %c0_13] : memref<1x8x128xf32, #tpu.memory_space<vmem>>, vector<1x8x128xf32>
    %26 = vector.shape_cast %25 : vector<1x8x128xf32> to vector<8x128xf32>
    %27 = vector.shape_cast %24 : vector<8x128xf32> to vector<1x8x128xf32>
    tpu.vector_store %arg5[%c0_11, %c0_12, %c0_13], %27 {strides = array<i32>} : memref<1x8x128xf32, #tpu.memory_space<vmem>>, vector<1x8x128xf32>,
    %c0_14 = arith.constant 0 : index
    %c0_15 = arith.constant 0 : index
    %c0_16 = arith.constant 0 : index
    %28 = vector.load %arg6[%c0_14, %c0_15, %c0_16] : memref<1x1x128xf32, #tpu.memory_space<vmem>>, vector<1x1x128xf32>
    %29 = vector.shape_cast %28 : vector<1x1x128xf32> to vector<1x128xf32>
    %30 = vector.shape_cast %5 : vector<1x128xf32> to vector<1x1x128xf32>
    tpu.vector_store %arg6[%c0_14, %c0_15, %c0_16], %30 {strides = array<i32>} : memref<1x1x128xf32, #tpu.memory_space<vmem>>, vector<1x1x128xf32>,
    %c0_17 = arith.constant 0 : index
    %c0_18 = arith.constant 0 : index
    %c0_19 = arith.constant 0 : index
    %31 = vector.load %arg7[%c0_17, %c0_18, %c0_19] : memref<1x1x128xf32, #tpu.memory_space<vmem>>, vector<1x1x128xf32>
    %32 = vector.shape_cast %31 : vector<1x1x128xf32> to vector<1x128xf32>
    %33 = vector.shape_cast %15 : vector<1x128xf32> to vector<1x1x128xf32>
    tpu.vector_store %arg7[%c0_17, %c0_18, %c0_19], %33 {strides = array<i32>} : memref<1x1x128xf32, #tpu.memory_space<vmem>>, vector<1x1x128xf32>,
    return
  }
  func.func @transform_0(%arg0: i32, %arg1: i32) -> (i32, i32, i32) {
    %c0_i32 = arith.constant 0 : i32
    %c0_i32_0 = arith.constant 0 : i32
    return %arg0, %c0_i32, %arg1 : i32, i32, i32
  }
  func.func @transform_1(%arg0: i32, %arg1: i32) -> (i32, i32) {
    %c0_i32 = arith.constant 0 : i32
    %c0_i32_0 = arith.constant 0 : i32
    return %c0_i32, %arg1 : i32, i32
  }
  func.func @transform_2(%arg0: i32, %arg1: i32) -> (i32, i32) {
    %c0_i32 = arith.constant 0 : i32
    %c0_i32_0 = arith.constant 0 : i32
    return %c0_i32, %arg1 : i32, i32
  }
  func.func @transform_3(%arg0: i32, %arg1: i32) -> (i32, i32, i32) {
    %c0_i32 = arith.constant 0 : i32
    %c0_i32_0 = arith.constant 0 : i32
    return %arg0, %c0_i32, %arg1 : i32, i32, i32
  }
  func.func @transform_4(%arg0: i32, %arg1: i32) -> (i32, i32, i32) {
    %c0_i32 = arith.constant 0 : i32
    %c0_i32_0 = arith.constant 0 : i32
    return %arg0, %c0_i32, %arg1 : i32, i32, i32
  }
  func.func @transform_5(%arg0: i32, %arg1: i32) -> (i32, i32, i32) {
    %c0_i32 = arith.constant 0 : i32
    %c0_i32_0 = arith.constant 0 : i32
    return %arg0, %c0_i32, %arg1 : i32, i32, i32
  }
}

</mosaic_0001>

<bundles_post_ra>
// kernel: tpu_custom_call.1
= control target key start
LH: loop header
LB: loop body
LE: loop exit
PB: predicated region body
PF: predicated region fallthrough
CT: control target
= control target key end

     0   :  { %11 = vsyncpa [#allocation3], 0  ;;  %s1126_s0 = inlined_call_operand.hbm [shape: f32[4,8,128], index: 0, kind: input, shape index: {}]   ;;  %s1127_s1 = inlined_call_operand.vmem [shape: f32[1,128], index: 1, kind: input, shape index: {}]   ;;  %s1128_s2 = inlined_call_operand.vmem [shape: f32[1,128], index: 2, kind: input, shape index: {}]   ;;  %s1129_s3 = inlined_call_operand.hbm [shape: f32[4,8,128], index: 3, kind: output, shape index: {0}]   ;;  %s1130_s4 = inlined_call_operand.hbm [shape: f32[4,1,128], index: 4, kind: output, shape index: {1}]   ;;  %s1131_s5 = inlined_call_operand.hbm [shape: f32[4,1,128], index: 5, kind: output, shape index: {2}]  }
   0x1   :  { %13 = vsyncpa [#allocation3 + $0x1], 0 }
   0x2   :  { %14 = vsyncpa [#allocation4], 0 }
   0x3   :  { %16 = vsyncpa [#allocation4 + $0x1], 0 }
   0x4   :  { %17 = vsyncpa [#allocation7], 0 }
   0x5   :  { %19 = vsyncpa [#allocation7 + $0x1], 0  ;;  %s865_s18 = smov 0   ;;  %s867_s19 = smov 0  }
   0x6   :  { %s869_s20 = smov 0   ;;  %s871_s21 = smov 0  }
   0x7   :  { %s873_s22 = smov 0   ;;  %s875_s23 = smov 0  }
   0x8 LB: > { %s896_s24 = sadd.s32 4294967295, %s829_s23   ;;  %s564_s25 = sadd.s32 4294967294, %s829_s23   ;;  %s829_s23 = sphi %s875_s23, %s25_s23   ;;  %s825_s22 = sphi %s873_s22, %s1146_s22   ;;  %s821_s21 = sphi %s871_s21, %s1145_s21   ;;  %s817_s20 = sphi %s869_s20, %s1144_s20   ;;  %s813_s19 = sphi %s867_s19, %s1143_s19   ;;  %s809_s18 = sphi %s865_s18, %s1142_s18  }
   0x9   : > { %s37_s26 = sadd.s32 1, %s825_s22  ;;  %s46_s27 = sadd.s32 1, %s817_s20 }
   0xa   : > { %p39_p0 = scmp.ge.s32.totalorder %s37_s26, 4  ;;  %p53_p1 = scmp.ne.s32.totalorder %s817_s20, %s813_s19 }
   0xb   : > { %p54_p2 = scmp.eq.s32.totalorder %s829_s23, 0  ;;  %p59_p3 = scmp.ne.s32.totalorder %s813_s19, %s809_s18 }
   0xc   : > { %s1148_s26 = smov (%p39_p0, %s37_s26), 0  ;;  %p60_p5 = scmp.eq.s32.totalorder %s896_s24, 0 }
   0xd   : > { %p908_p4 = por %p54_p2, %p53_p1  ;;  %s41_s29 = ssub.s32 %s825_s22, %s1148_s26 }
   0xe   : > { %p137_p6 = scmp.eq.s32.totalorder %s896_s24, 3  ;;  %p44_p7 = scmp.eq.s32.totalorder %s41_s29, 0 }
   0xf   : > { %p916_p8 = por %p60_p5, %p59_p3  ;;  %p143_p10 = scmp.eq.s32.totalorder %s564_s25, 3 }
  0x10   : > { %p920_p9 = por %p137_p6, %p53_p1  ;;  %p603_p12 = scmp.lt.s32.totalorder %s829_s23, 4 }
  0x11   : > { %s927_s7 = scalar_select %p44_p7, %s817_s20, %s46_s27  }
  0x12   : > { %s1135_s6 = scalar_select %p920_p9, 1, 0 }
  0x13   : > { %p929_p11 = por %p143_p10, %p59_p3  ;;  %s231_s9 = sand.u32 1, %s817_s20  }
  0x14   : > { %s569_s10 = sshll.u32 %s231_s9, 3  ;;  %s570_s11 = sshll.u32 %s825_s22, 7 }
  0x15   : > { %s1136_s8 = scalar_select %p929_p11, 1, 0 }
  0x16   : > { %s939_s14 = scalar_lea.hbm %s1126_s0, %s570_s11  ;;  %s235_s15 = scalar_lea.vmem [#allocation2], %s569_s10 }
  0x17   : > { %s243_s16 = sshll.u32 %s235_s15, 4  ;;  %p945_p13 = pnand %p603_p12, %p908_p4  ;;  %s941_s16 = int_to_ptr.vmem [resolvable:$true] %s243_s16 }
  0x18   : > { %s232_s27 = scalar_lea.sflag [#allocation3], %s231_s9  ;;  %s657_s29 = scalar_lea.hbm %s939_s14, 128 }
  0x19   : > { %p658_p2 = scmp.ne.s32.totalorder %s939_s14, %s657_s29  ;;  %p659_p3 = pneg %p945_p13 }
  0x1a   : > { %s662_s28 = scalar_lea.hbm %s1126_s0, 512  ;;  %p663_p4 = scmp.lt.u32.totalorder %s939_s14, %s1126_s0 }
  0x1b   : > { %p660_p5 = pnand %p659_p3, %p658_p2  ;;  %p664_p7 = scmp.lt.u32.totalorder %s662_s28, %s657_s29 }
  0x1c   : > { %p666_p12 = scmp.lt.u32.totalorder %s657_s29, %s939_s14 }
  0x1d   : > { %p661_p6 = pneg %p660_p5  ;;  %p665_p10 = por %p664_p7, %p663_p4 }
  0x1f   : > { %p667_p0 = por %p666_p12, %p665_p10 }
  0x21   : > { %p668_p1 = pnand %p667_p0, %p661_p6 }
  0x23   : > { %671 = shalt.err (!%p668_p1)
}
  0x24   : > { %s672_s9 = scalar_lea.vmem %s941_s16, 128  ;;  %s831_s15 = smov [#allocation2]  }
  0x25   : > { %p673_p2 = scmp.ne.s32.totalorder %s941_s16, %s672_s9  ;;  %s677_s10 = sshll.u32 %s831_s15, 4  ;;  %s678_s10 = int_to_ptr.vmem [resolvable:$false] %s677_s10 }
  0x26   : > { %s679_s11 = scalar_lea.vmem %s678_s10, 256  ;;  %p680_p9 = scmp.lt.s32.totalorder %s941_s16, %s678_s10 }
  0x27   : > { %p675_p5 = pnand %p673_p2, %p659_p3  ;;  %p681_p4 = scmp.lt.s32.totalorder %s679_s11, %s672_s9 }
  0x29   : > { %p676_p11 = pneg %p675_p5  ;;  %p682_p7 = por %p681_p4, %p680_p9 }
  0x2b   : > { %p683_p10 = pnand %p682_p7, %p676_p11 }
  0x2d   : > { %686 = shalt.err (!%p683_p10)
}
  0x2e   : > { %592 = dma.hbm_to_vmem [thread:$0]  (!%p945_p13), %s939_s14, 128, %s941_s16, %s232_s27  }
  0x2f   : > { %p1138_p0 = scmp.lt.s32.totalorder %s829_s23, 5  ;;  %p1139_p1 = scmp.ge.s32.totalorder %s829_s23, 1 }
  0x31   : > { %p249_p3 = pnand %p1139_p1, %p1138_p0 }
  0x32   : > { %s981_s29 = sand.u32 (!%p249_p3), 1, %s813_s19  }
  0x33   : > { %252 = sbr.rel (%p249_p3) target bundleno = 159 (0x9f), region = 32  ;;  %s572_s28 = sshll.u32 (!%p249_p3), %s981_s29, 3 }
  0x34   : > { %s255_s12 = scalar_lea.sflag (!%p249_p3), [#allocation3], %s981_s29  ;;  %s258_s17 = scalar_lea.vmem (!%p249_p3), [#allocation2], %s572_s28 }
  0x3a   : > { %796 = dma.done.wait (%p916_p8), %s255_s12, 128  }
  0x3b   : > { %798 = vsyncadd (%p916_p8), %s255_s12, 4294967168  ;;  %v305_v0 = vld [vmem:[%s258_s17] sm:$0xff]  ;;  %s292_s14 = scalar_lea.vmem [#allocation6], %s981_s29  ;;  %s358_s27 = sand.u32 1, %s896_s24  }
  0x3c   : > { %v306_v1 = vrot.slane %v305_v0, 4  ;;  %s390_s16 = sshll.u32 %s292_s14, 4  ;;  %s577_s13 = sshll.u32 %s821_s21, 4  ;;  %s994_s16 = int_to_ptr.vmem [resolvable:$true] %s390_s16 }
  0x3d   : > { %s1001_s15 = scalar_lea.hbm %s1130_s4, %s577_s13  ;;  %s1005_s10 = scalar_lea.sflag [#allocation7], %s358_s27 }
  0x3e   : > { %v307_v2 = vadd.f32 %v306_v1, %v305_v0  ;;  %s687_s24 = scalar_lea.vmem %s994_s16, 16  ;;  %p1140_p9 = scmp.ne.s32.totalorder %s1135_s6, 0 }
  0x3f   : > { %p688_p8 = scmp.ne.s32.totalorder %s994_s16, %s687_s24  ;;  %s832_s11 = smov [#allocation6]  }
  0x40   : > { %v308_v3 = vrot.slane %v307_v2, 2  ;;  %s691_s12 = sshll.u32 %s832_s11, 4  ;;  %s692_s12 = int_to_ptr.vmem [resolvable:$false] %s691_s12 }
  0x41   : > { %p689_p11 = pnand %p688_p8, %p1140_p9  ;;  %s693_s17 = scalar_lea.vmem %s692_s12, 32 }
  0x42   : > { %v309_v4 = vadd.f32 %v308_v3, %v307_v2  ;;  %p694_p6 = scmp.lt.s32.totalorder %s994_s16, %s692_s12  ;;  %p695_p12 = scmp.lt.s32.totalorder %s693_s17, %s687_s24 }
  0x43   : > { %p690_p13 = pneg %p689_p11 }
  0x44   : > { %v310_v5 = vrot.slane %v309_v4, 1  ;;  %p696_p2 = por %p695_p12, %p694_p6 }
  0x46   : > { %v311_v6 = vadd.f32 %v310_v5, %v309_v4  ;;  %p697_p5 = pnand %p696_p2, %p690_p13 }
  0x48   : > { %v313_v7 = vmul.f32 0.125, %v311_v6 }
  0x4a   : > { %v1003_v8 = vsub.f32 %v305_v0, %v313_v7  ;;  %351 = vst [vmem:[%s292_s14] sm:$0x1] %v313_v7 }
  0x4b   : > { %700 = shalt.err (!%p697_p5)
}
  0x4c   : > { %s701_s14 = scalar_lea.hbm %s1001_s15, 16  ;;  %s705_s9 = scalar_lea.hbm %s1130_s4, 64 }
  0x4d   : > { %p702_p4 = scmp.ne.s32.totalorder %s1001_s15, %s701_s14  ;;  %p706_p0 = scmp.lt.u32.totalorder %s1001_s15, %s1130_s4 }
  0x4e   : > { %p707_p1 = scmp.lt.u32.totalorder %s705_s9, %s701_s14  ;;  %p709_p8 = scmp.lt.u32.totalorder %s701_s14, %s1001_s15 }
  0x4f   : > { %p703_p7 = pnand %p702_p4, %p1140_p9 }
  0x50   : > { %p708_p3 = por %p707_p1, %p706_p0 }
  0x51   : > { %p704_p10 = pneg %p703_p7 }
  0x52   : > { %p710_p11 = por %p709_p8, %p708_p3 }
  0x54   : > { %p711_p13 = pnand %p710_p11, %p704_p10 }
  0x56   : > { %714 = shalt.err (!%p711_p13)
}
  0x57   : > { %584 = dma.vmem_to_hbm [thread:$0]  (%p1140_p9), %s994_s16, 16, %s1001_s15, %s1005_s10   ;;  %v315_v9 = vmul.f32 %v1003_v8, %v1003_v8  ;;  %v336_v23 = vlaneseq }
  0x58   : > { %s298_s24 = scalar_lea.vmem [#allocation8], %s981_s29  ;;  %s1039_s14 = scalar_lea.hbm %s1131_s5, %s577_s13 }
  0x59   : > { %v316_v10 = vrot.slane %v315_v9, 4  ;;  %s404_s17 = sshll.u32 %s298_s24, 4  ;;  %s833_s30 = smov [#allocation8]   ;;  %s1032_s17 = int_to_ptr.vmem [resolvable:$true] %s404_s17 }
  0x5a   : > { %s715_s27 = scalar_lea.vmem %s1032_s17, 16  ;;  %s719_s9 = sshll.u32 %s833_s30, 4  ;;  %s720_s9 = int_to_ptr.vmem [resolvable:$false] %s719_s9 }
  0x5b   : > { %v317_v11 = vadd.f32 %v316_v10, %v315_v9  ;;  %p716_p6 = scmp.ne.s32.totalorder %s1032_s17, %s715_s27  ;;  %s721_s11 = scalar_lea.vmem %s720_s9, 32 }
  0x5c   : > { %p722_p5 = scmp.lt.s32.totalorder %s1032_s17, %s720_s9  ;;  %p723_p4 = scmp.lt.s32.totalorder %s721_s11, %s715_s27 }
  0x5d   : > { %v318_v12 = vrot.slane %v317_v11, 2  ;;  %p717_p12 = pnand %p716_p6, %p1140_p9 }
  0x5e   : > { %p724_p7 = por %p723_p4, %p722_p5 }
  0x5f   : > { %v319_v13 = vadd.f32 %v318_v12, %v317_v11  ;;  %p718_p2 = pneg %p717_p12 }
  0x61   : > { %v320_v14 = vrot.slane %v319_v13, 1  ;;  %p725_p10 = pnand %p724_p7, %p718_p2 }
  0x63   : > { %v321_v15 = vadd.f32 %v320_v14, %v319_v13 }
  0x65   : > { %v322_v16 = vmul.f32 0.14285715, %v321_v15 }
  0x67   : > { %v323_v17 = vadd.f32 1e-05, %v322_v16 }
  0x69   : > { %653 = vrsqrt.f32 %v323_v17  ;;  %vm326_vm0 = vcmp.eq.f32.partialorder %v323_v17, inf  ;;  %v329_v19 = vand.u32 2147483648, %v323_v17  ;;  %vm328_vm1 = vcmp.eq.f32.partialorder %v323_v17, 0.0 }
  0x73   : > { %v654_v18 = vpop.eup %653 }
  0x74   : > { %v325_v20 = vmul.f32 %v654_v18, %v323_v17 }
  0x76   : > { %v327_v21 = vsel %vm326_vm0, %v323_v17, %v325_v20 }
  0x77   : > { %v330_v22 = vsel %vm328_vm1, %v329_v19, %v327_v21 }
  0x78   : > { %655 = vrcp.f32 %v330_v22  ;;  %352 = vst [vmem:[%s298_s24] sm:$0x1] %v330_v22 }
  0x79   : > { %728 = shalt.err (!%p725_p10)
}
  0x7a   : > { %s729_s13 = scalar_lea.hbm %s1039_s14, 16  ;;  %s733_s16 = scalar_lea.hbm %s1131_s5, 64 }
  0x7b   : > { %p730_p0 = scmp.ne.s32.totalorder %s1039_s14, %s729_s13  ;;  %p734_p8 = scmp.lt.u32.totalorder %s1039_s14, %s1131_s5 }
  0x7c   : > { %p735_p11 = scmp.lt.u32.totalorder %s733_s16, %s729_s13  ;;  %p737_p6 = scmp.lt.u32.totalorder %s729_s13, %s1039_s14 }
  0x7d   : > { %p731_p1 = pnand %p730_p0, %p1140_p9 }
  0x7e   : > { %p736_p13 = por %p735_p11, %p734_p8 }
  0x7f   : > { %p732_p3 = pneg %p731_p1 }
  0x80   : > { %p738_p12 = por %p737_p6, %p736_p13 }
  0x82   : > { %p739_p2 = pnand %p738_p12, %p732_p3 }
  0x84   : > { %742 = shalt.err (!%p739_p2)
}
  0x85   : > { %585 = dma.vmem_to_hbm [thread:$0]  (%p1140_p9), %s1032_s17, 16, %s1039_s14, %s1005_s10   ;;  %v337_v24 = vshrl.u32 %v336_v23, 7  ;;  %v333_v25 = vld [vmem:[%s1127_s1] sm:$0x1]  ;;  %v656_v27 = vpop.eup %655 }
  0x86   : > { %v334_v28 = vmul.f32 %v656_v27, %v333_v25  ;;  %s286_s11 = scalar_lea.vmem [#allocation5], %s572_s28  ;;  %v574_v30 = vld [vmem:[%s1128_s2] ss:$0 sm:$0xff]  ;;  %s576_s16 = sshll.u32 %s821_s21, 7 }
  0x87   : > { %v338_v26 = vsub.s32 0, %v337_v24  ;;  %s376_s13 = sshll.u32 %s286_s11, 4  ;;  %s1078_s14 = scalar_lea.hbm %s1129_s3, %s576_s16  ;;  %s1073_s13 = int_to_ptr.vmem [resolvable:$true] %s376_s13 }
  0x88   : > { %s354_s28 = scalar_lea.sflag [#allocation4], %s981_s29  ;;  %s743_s15 = scalar_lea.vmem %s1073_s13, 128 }
  0x89   : > { %v339_v29 = vrot.slane %v334_v28, %v338_v26  ;;  %p744_p5 = scmp.ne.s32.totalorder %s1073_s13, %s743_s15  ;;  %s834_s21 = smov [#allocation5]  }
  0x8a   : > { %s747_s30 = sshll.u32 %s834_s21, 4  ;;  %s748_s30 = int_to_ptr.vmem [resolvable:$false] %s747_s30 }
  0x8b   : > { %v341_v31 = vmul.f32 %v339_v29, %v1003_v8  ;;  %p745_p4 = pnand %p744_p5, %p1140_p9  ;;  %s749_s27 = scalar_lea.vmem %s748_s30, 256 }
  0x8c   : > { %p750_p10 = scmp.lt.s32.totalorder %s1073_s13, %s748_s30  ;;  %p751_p0 = scmp.lt.s32.totalorder %s749_s27, %s743_s15 }
  0x8d   : > { %v349_v32 = vadd.f32 %v574_v30, %v341_v31  ;;  %p746_p7 = pneg %p745_p4 }
  0x8e   : > { %p752_p1 = por %p751_p0, %p750_p10 }
  0x8f   : > { %350 = vst [vmem:[%s286_s11] sm:$0xff] %v349_v32 }
  0x90   : > { %p753_p3 = pnand %p752_p1, %p746_p7 }
  0x92   : > { %756 = shalt.err (!%p753_p3)
}
  0x93   : > { %s757_s29 = scalar_lea.hbm %s1078_s14, 128  ;;  %s761_s12 = scalar_lea.hbm %s1129_s3, 512 }
  0x94   : > { %p758_p8 = scmp.ne.s32.totalorder %s1078_s14, %s757_s29  ;;  %p762_p6 = scmp.lt.u32.totalorder %s1078_s14, %s1129_s3 }
  0x95   : > { %p763_p12 = scmp.lt.u32.totalorder %s761_s12, %s757_s29  ;;  %p765_p5 = scmp.lt.u32.totalorder %s757_s29, %s1078_s14 }
  0x96   : > { %p759_p11 = pnand %p758_p8, %p1140_p9 }
  0x97   : > { %p764_p2 = por %p763_p12, %p762_p6 }
  0x98   : > { %p760_p13 = pneg %p759_p11 }
  0x99   : > { %p766_p4 = por %p765_p5, %p764_p2 }
  0x9b   : > { %p767_p7 = pnand %p766_p4, %p760_p13 }
  0x9d   : > { %770 = shalt.err (!%p767_p7)
}
  0x9e   : > { %583 = dma.vmem_to_hbm [thread:$0]  (%p1140_p9), %s1073_s13, 128, %s1078_s14, %s354_s28  }
  0x9f PF: > { %p604_p10 = scmp.ge.s32.totalorder %s829_s23, 2  ;;  %s416_s10 = sand.u32 1, %s809_s18  }
  0xa0   : > { %p1141_p0 = scmp.ne.s32.totalorder %s1136_s8, 0  ;;  %s417_s17 = scalar_lea.sflag [#allocation4], %s416_s10 }
  0xa2   : > { %p594_p1 = pnand %p604_p10, %p1141_p0 }
  0xa4   : > { %800 = dma.done.wait (!%p594_p1), %s417_s17, 128  }
  0xa5   : > { %802 = vsyncadd (!%p594_p1), %s417_s17, 4294967168  ;;  %s425_s15 = sand.u32 1, %s564_s25  }
  0xa6   : > { %s426_s21 = scalar_lea.sflag [#allocation7], %s425_s15 }
  0xa7   : > { %804 = dma.done.wait (!%p594_p1), %s426_s21, 32  }
  0xa8   : > { %806 = vsyncadd (!%p594_p1), %s426_s21, 4294967264  ;;  %s25_s23 = sadd.s32 1, %s829_s23   ;;  %s1142_s18 = smov %s813_s19 }
  0xa9   : > { %p22_p9 = scmp.ge.s32.totalorder %s25_s23, 6   ;;  %s1143_s19 = smov %s817_s20 }
  0xaa   : > { %s1144_s20 = smov %s927_s7  ;;  %s1145_s21 = smov %s825_s22 }
  0xab   : > { %s1146_s22 = smov %s1148_s26  ;;  %24 = sbr.rel (!%p22_p9) target bundleno = 8 (0x8), region = 115 }
  0xb2   :  { %438 = vsyncpa [#allocation3], 1 }
  0xb3   :  { %440 = vsyncpa [#allocation3 + $0x1], 1 }
  0xb4   :  { %441 = vsyncpa [#allocation4], 1 }
  0xb5   :  { %443 = vsyncpa [#allocation4 + $0x1], 1 }
  0xb6   :  { %444 = vsyncpa [#allocation7], 1 }
  0xb7   :  { %446 = vsyncpa [#allocation7 + $0x1], 1 }

</bundles_post_ra>
